<compile_context>
chip_gen: v6e
topology: v6e:2x2x1
jax: 0.10.0
libtpu: 0.0.40
codegen_flags: <defaults>
</compile_context>

<pallas_src>
import jax
import jax.numpy as jnp
from jax.experimental import pallas as pl
from jax.experimental.pallas import tpu as pltpu


def _make_kernel(H, W, C, Cout, K, padding, use_mxu):
    P = H * W

    def kernel(x_ref, rc_ref, dw_ref, pw_ref, out_ref):
        # x_ref  : (1, C, P)       one batch element, spatial flattened (lane-dense)
        # rc_ref : (2, P) int32    [row, col] of every flattened spatial position
        # dw_ref : (K*K, C, 1)     depthwise weights, one (C, 1) vector per tap
        # pw_ref : (C, Cout, 1)    [VPU path]   or   (Cout, C) [MXU path]
        # out_ref: (1, Cout, P)    lane-dense output block
        x = x_ref[0].astype(jnp.float32)          # no-op cast for f32 inputs
        dw = dw_ref[...].astype(jnp.float32)      # (K*K, C, 1)
        rc = rc_ref[...]
        row = rc[0:1, :]                          # (1, P)
        col = rc[1:2, :]                          # (1, P)

        # Depthwise KxK, stride 1: K*K static lane-rolls (XLU) + masked VPU FMAs.
        # The roll wraps out-of-image positions around; the border mask zeroes
        # them, which is exactly the zero-padding of the reference convolution.
        acc = jnp.zeros((C, P), jnp.float32)
        t = 0
        for kh in range(K):
            dh = kh - padding
            for kw in range(K):
                dwc = kw - padding
                shift = (-(dh * W + dwc)) % P
                x_sh = pltpu.roll(x, shift=shift, axis=1) if shift else x
                valid = ((row + dh >= 0) & (row + dh < H) &
                         (col + dwc >= 0) & (col + dwc < W))        # (1, P)
                acc = acc + jnp.where(valid, x_sh, 0.0) * dw[t]     # (C,P)*(C,1)
                t += 1

        # Pointwise 1x1 conv.
        if use_mxu:
            # (Cout, C) @ (C, P) on the MXU for realistic channel counts.
            # TODO(synk): pad C/Cout to multiples of 128 (v5e) / 256 (v6e, v7x)
            # and slice the padding off outside for full MXU utilization.
            y = jnp.dot(pw_ref[...].astype(jnp.float32), acc,
                        preferred_element_type=jnp.float32)
        else:
            # Tiny C*Cout: skip the MXU, do C broadcast-MACs on the VPU.
            pw = pw_ref[...].astype(jnp.float32)   # (C, Cout, 1)
            y = jnp.zeros((Cout, P), jnp.float32)
            for c in range(C):
                y = y + acc[c:c + 1, :] * pw[c]    # (1,P)*(Cout,1) -> (Cout,P)

        out_ref[0] = y.astype(out_ref.dtype)

    return kernel


def depthwise_separable_conv(x_nchw, dw_weight, pw_weight, *, padding=1):
    """x_nchw: (N, C, H, W); dw_weight: (C, 1, K, K); pw_weight: (Cout, C, 1, 1).
    Returns (N, Cout, H, W).  Stride fixed at 1 (the module's default)."""
    N, C, H, W = x_nchw.shape
    K = dw_weight.shape[-1]
    Cout = pw_weight.shape[0]
    P = H * W

    # HBM side: free, contiguous reshapes only (no pad, no transpose of x).
    x_flat = x_nchw.reshape(N, C, P)

    # (row, col) lookup for in-kernel border masking: tiny (2*P int32) constant
    # shared by every grid step (avoids vector int div/mod inside the kernel).
    rr = jnp.arange(P, dtype=jnp.int32)
    rc = jnp.stack([rr // W, rr % W], axis=0)                        # (2, P)

    # Tiny weight re-layouts (K*K*C and C*Cout elements; negligible).
    dw_taps = jnp.transpose(dw_weight[:, 0].reshape(C, K * K), (1, 0))[..., None]  # (K*K, C, 1)

    use_mxu = (C * Cout) >= 4096
    if use_mxu:
        pw_arg = pw_weight[:, :, 0, 0]                                    # (Cout, C)
        pw_spec = pl.BlockSpec((Cout, C), lambda n: (0, 0))
    else:
        pw_arg = jnp.transpose(pw_weight[:, :, 0, 0], (1, 0))[..., None]  # (C, Cout, 1)
        pw_spec = pl.BlockSpec((C, Cout, 1), lambda n: (0, 0, 0))

    out_flat = pl.pallas_call(
        _make_kernel(H, W, C, Cout, K, padding, use_mxu),
        out_shape=jax.ShapeDtypeStruct((N, Cout, P), x_nchw.dtype),
        grid_spec=pltpu.PrefetchScalarGridSpec(
            num_scalar_prefetch=0,
            grid=(N,),
            in_specs=[
                pl.BlockSpec((1, C, P), lambda n: (n, 0, 0)),
                pl.BlockSpec((2, P), lambda n: (0, 0)),
                pl.BlockSpec((K * K, C, 1), lambda n: (0, 0, 0)),
                pw_spec,
            ],
            out_specs=pl.BlockSpec((1, Cout, P), lambda n: (n, 0, 0)),
        ),
        # Batch axis shards across TensorCores (megacore / v7x 2-TC).
        compiler_params=pltpu.CompilerParams(dimension_semantics=("parallel",)),
        # TODO(synk): for large H*W*C (v7x: 64 MiB VMEM) add an H-strip grid axis
        # with a 1-row halo (manual DMA) instead of one whole image per grid step.
    )(x_flat, rc, dw_taps, pw_arg)

    return out_flat.reshape(N, Cout, H, W)


def _reference(x_nchw, dw_weight, pw_weight, padding=1):
    """Plain-JAX reference (NCHW), used only for a correctness check."""
    N, C, H, W = x_nchw.shape
    K = dw_weight.shape[-1]
    xp = jnp.pad(x_nchw, ((0, 0), (0, 0), (padding, padding), (padding, padding)))
    acc = jnp.zeros((N, C, H, W), jnp.float32)
    for kh in range(K):
        for kw in range(K):
            acc = acc + xp[:, :, kh:kh + H, kw:kw + W] * dw_weight[:, 0, kh, kw][None, :, None, None]
    return jnp.einsum("nchw,oc->nohw", acc, pw_weight[:, :, 0, 0])


if __name__ == "__main__":
    key = jax.random.PRNGKey(0)
    k_x, k_dw, k_pw = jax.random.split(key, 3)

    N, Cin, Cout, H, W, K = 2, 4, 8, 16, 16, 3

    x = jax.random.normal(k_x, (N, Cin, H, W), dtype=jnp.float32)
    # nn.Conv2d(in, in, 3, groups=in, bias=False) weight shape: (Cin, 1, K, K)
    dw_weight = jax.random.normal(k_dw, (Cin, 1, K, K), dtype=jnp.float32) * 0.1
    # nn.Conv2d(in, out, 1, bias=False) weight shape: (Cout, Cin, 1, 1)
    pw_weight = jax.random.normal(k_pw, (Cout, Cin, 1, 1), dtype=jnp.float32) * 0.1

    conv = jax.jit(depthwise_separable_conv, static_argnames=("padding",))
    out = jax.block_until_ready(conv(x, dw_weight, pw_weight, padding=1))

    ref = _reference(x, dw_weight, pw_weight, padding=1)
    assert out.shape == (N, Cout, H, W)
    assert jnp.allclose(out, ref, rtol=1e-4, atol=1e-5), "mismatch vs reference"

    print("KERNEL_OK")
</pallas_src>

<mosaic_0001>
module attributes {stable_mosaic.version = 11 : i64} {
  func.func @kernel(%arg0: i32, %arg1: memref<1x4x256xf32, #tpu.memory_space<vmem>>, %arg2: memref<2x256xi32, #tpu.memory_space<vmem>>, %arg3: memref<9x4x1xf32, #tpu.memory_space<vmem>>, %arg4: memref<4x8x1xf32, #tpu.memory_space<vmem>>, %arg5: memref<1x8x256xf32, #tpu.memory_space<vmem>>) attributes {dimension_semantics = [#tpu.dimension_semantics<parallel>], iteration_bounds = array<i64: 2>, scalar_prefetch = 0 : i64, scratch_operands = 0 : i64, tpu.core_type = #tpu.core_type<tc>, window_params = [{transform_indices = @transform_0, window_bounds = array<i64: 1, 4, 256>}, {pipeline_mode = #tpu.pipeline_mode<synchronous>, transform_indices = @transform_1, window_bounds = array<i64: 2, 256>}, {pipeline_mode = #tpu.pipeline_mode<synchronous>, transform_indices = @transform_2, window_bounds = array<i64: 9, 4, 1>}, {pipeline_mode = #tpu.pipeline_mode<synchronous>, transform_indices = @transform_3, window_bounds = array<i64: 4, 8, 1>}, {transform_indices = @transform_4, window_bounds = array<i64: 1, 8, 256>}]} {
    %c0 = arith.constant 0 : index
    %c0_0 = arith.constant 0 : index
    %c0_1 = arith.constant 0 : index
    %0 = vector.load %arg1[%c0, %c0_0, %c0_1] : memref<1x4x256xf32, #tpu.memory_space<vmem>>, vector<1x4x256xf32>
    %1 = vector.shape_cast %0 : vector<1x4x256xf32> to vector<4x256xf32>
    %c0_2 = arith.constant 0 : index
    %c0_3 = arith.constant 0 : index
    %c0_4 = arith.constant 0 : index
    %2 = vector.load %arg3[%c0_2, %c0_3, %c0_4] : memref<9x4x1xf32, #tpu.memory_space<vmem>>, vector<9x4x1xf32>
    %c0_5 = arith.constant 0 : index
    %c0_6 = arith.constant 0 : index
    %3 = vector.load %arg2[%c0_5, %c0_6] : memref<2x256xi32, #tpu.memory_space<vmem>>, vector<2x256xi32>
    %4 = vector.extract_strided_slice %3 {offsets = [0, 0], sizes = [1, 256], strides = [1, 1]} : vector<2x256xi32> to vector<1x256xi32>
    %5 = vector.extract_strided_slice %3 {offsets = [1, 0], sizes = [1, 256], strides = [1, 1]} : vector<2x256xi32> to vector<1x256xi32>
    %cst = arith.constant 0.000000e+00 : f32
    %6 = vector.broadcast %cst : f32 to vector<4x256xf32>
    %c17_i32 = arith.constant 17 : i32
    %7 = tpu.dynamic_rotate %1 by %c17_i32 dim 1 : vector<4x256xf32>, i32 -> vector<4x256xf32>
    %c-1_i32 = arith.constant -1 : i32
    %8 = vector.broadcast %c-1_i32 : i32 to vector<1x256xi32>
    %9 = arith.addi %4, %8 : vector<1x256xi32>
    %c0_i32 = arith.constant 0 : i32
    %10 = vector.broadcast %c0_i32 : i32 to vector<1x256xi32>
    %11 = arith.cmpi sge, %9, %10 : vector<1x256xi32>
    %c-1_i32_7 = arith.constant -1 : i32
    %12 = vector.broadcast %c-1_i32_7 : i32 to vector<1x256xi32>
    %13 = arith.addi %4, %12 : vector<1x256xi32>
    %c16_i32 = arith.constant 16 : i32
    %14 = vector.broadcast %c16_i32 : i32 to vector<1x256xi32>
    %15 = arith.cmpi slt, %13, %14 : vector<1x256xi32>
    %16 = arith.andi %11, %15 : vector<1x256xi1>
    %c-1_i32_8 = arith.constant -1 : i32
    %17 = vector.broadcast %c-1_i32_8 : i32 to vector<1x256xi32>
    %18 = arith.addi %5, %17 : vector<1x256xi32>
    %c0_i32_9 = arith.constant 0 : i32
    %19 = vector.broadcast %c0_i32_9 : i32 to vector<1x256xi32>
    %20 = arith.cmpi sge, %18, %19 : vector<1x256xi32>
    %21 = arith.andi %16, %20 : vector<1x256xi1>
    %c-1_i32_10 = arith.constant -1 : i32
    %22 = vector.broadcast %c-1_i32_10 : i32 to vector<1x256xi32>
    %23 = arith.addi %5, %22 : vector<1x256xi32>
    %c16_i32_11 = arith.constant 16 : i32
    %24 = vector.broadcast %c16_i32_11 : i32 to vector<1x256xi32>
    %25 = arith.cmpi slt, %23, %24 : vector<1x256xi32>
    %26 = arith.andi %21, %25 : vector<1x256xi1>
    %cst_12 = arith.constant 0.000000e+00 : f32
    %27 = vector.shape_cast %26 : vector<1x256xi1> to vector<1x256xi1>
    %28 = vector.broadcast %27 : vector<1x256xi1> to vector<4x256xi1>
    %29 = vector.broadcast %cst_12 : f32 to vector<4x256xf32>
    %30 = arith.select %28, %7, %29 : vector<4x256xi1>, vector<4x256xf32>
    %31 = vector.extract_strided_slice %2 {offsets = [0, 0, 0], sizes = [1, 4, 1], strides = [1, 1, 1]} : vector<9x4x1xf32> to vector<1x4x1xf32>
    %32 = vector.shape_cast %31 : vector<1x4x1xf32> to vector<4x1xf32>
    %33 = vector.broadcast %32 : vector<4x1xf32> to vector<4x256xf32>
    %34 = arith.mulf %30, %33 : vector<4x256xf32>
    %35 = arith.addf %6, %34 : vector<4x256xf32>
    %c16_i32_13 = arith.constant 16 : i32
    %36 = tpu.dynamic_rotate %1 by %c16_i32_13 dim 1 : vector<4x256xf32>, i32 -> vector<4x256xf32>
    %c-1_i32_14 = arith.constant -1 : i32
    %37 = vector.broadcast %c-1_i32_14 : i32 to vector<1x256xi32>
    %38 = arith.addi %4, %37 : vector<1x256xi32>
    %c0_i32_15 = arith.constant 0 : i32
    %39 = vector.broadcast %c0_i32_15 : i32 to vector<1x256xi32>
    %40 = arith.cmpi sge, %38, %39 : vector<1x256xi32>
    %c-1_i32_16 = arith.constant -1 : i32
    %41 = vector.broadcast %c-1_i32_16 : i32 to vector<1x256xi32>
    %42 = arith.addi %4, %41 : vector<1x256xi32>
    %c16_i32_17 = arith.constant 16 : i32
    %43 = vector.broadcast %c16_i32_17 : i32 to vector<1x256xi32>
    %44 = arith.cmpi slt, %42, %43 : vector<1x256xi32>
    %45 = arith.andi %40, %44 : vector<1x256xi1>
    %c0_i32_18 = arith.constant 0 : i32
    %46 = vector.broadcast %c0_i32_18 : i32 to vector<1x256xi32>
    %47 = arith.addi %5, %46 : vector<1x256xi32>
    %c0_i32_19 = arith.constant 0 : i32
    %48 = vector.broadcast %c0_i32_19 : i32 to vector<1x256xi32>
    %49 = arith.cmpi sge, %47, %48 : vector<1x256xi32>
    %50 = arith.andi %45, %49 : vector<1x256xi1>
    %c0_i32_20 = arith.constant 0 : i32
    %51 = vector.broadcast %c0_i32_20 : i32 to vector<1x256xi32>
    %52 = arith.addi %5, %51 : vector<1x256xi32>
    %c16_i32_21 = arith.constant 16 : i32
    %53 = vector.broadcast %c16_i32_21 : i32 to vector<1x256xi32>
    %54 = arith.cmpi slt, %52, %53 : vector<1x256xi32>
    %55 = arith.andi %50, %54 : vector<1x256xi1>
    %cst_22 = arith.constant 0.000000e+00 : f32
    %56 = vector.shape_cast %55 : vector<1x256xi1> to vector<1x256xi1>
    %57 = vector.broadcast %56 : vector<1x256xi1> to vector<4x256xi1>
    %58 = vector.broadcast %cst_22 : f32 to vector<4x256xf32>
    %59 = arith.select %57, %36, %58 : vector<4x256xi1>, vector<4x256xf32>
    %60 = vector.extract_strided_slice %2 {offsets = [1, 0, 0], sizes = [1, 4, 1], strides = [1, 1, 1]} : vector<9x4x1xf32> to vector<1x4x1xf32>
    %61 = vector.shape_cast %60 : vector<1x4x1xf32> to vector<4x1xf32>
    %62 = vector.broadcast %61 : vector<4x1xf32> to vector<4x256xf32>
    %63 = arith.mulf %59, %62 : vector<4x256xf32>
    %64 = arith.addf %35, %63 : vector<4x256xf32>
    %c15_i32 = arith.constant 15 : i32
    %65 = tpu.dynamic_rotate %1 by %c15_i32 dim 1 : vector<4x256xf32>, i32 -> vector<4x256xf32>
    %c-1_i32_23 = arith.constant -1 : i32
    %66 = vector.broadcast %c-1_i32_23 : i32 to vector<1x256xi32>
    %67 = arith.addi %4, %66 : vector<1x256xi32>
    %c0_i32_24 = arith.constant 0 : i32
    %68 = vector.broadcast %c0_i32_24 : i32 to vector<1x256xi32>
    %69 = arith.cmpi sge, %67, %68 : vector<1x256xi32>
    %c-1_i32_25 = arith.constant -1 : i32
    %70 = vector.broadcast %c-1_i32_25 : i32 to vector<1x256xi32>
    %71 = arith.addi %4, %70 : vector<1x256xi32>
    %c16_i32_26 = arith.constant 16 : i32
    %72 = vector.broadcast %c16_i32_26 : i32 to vector<1x256xi32>
    %73 = arith.cmpi slt, %71, %72 : vector<1x256xi32>
    %74 = arith.andi %69, %73 : vector<1x256xi1>
    %c1_i32 = arith.constant 1 : i32
    %75 = vector.broadcast %c1_i32 : i32 to vector<1x256xi32>
    %76 = arith.addi %5, %75 : vector<1x256xi32>
    %c0_i32_27 = arith.constant 0 : i32
    %77 = vector.broadcast %c0_i32_27 : i32 to vector<1x256xi32>
    %78 = arith.cmpi sge, %76, %77 : vector<1x256xi32>
    %79 = arith.andi %74, %78 : vector<1x256xi1>
    %c1_i32_28 = arith.constant 1 : i32
    %80 = vector.broadcast %c1_i32_28 : i32 to vector<1x256xi32>
    %81 = arith.addi %5, %80 : vector<1x256xi32>
    %c16_i32_29 = arith.constant 16 : i32
    %82 = vector.broadcast %c16_i32_29 : i32 to vector<1x256xi32>
    %83 = arith.cmpi slt, %81, %82 : vector<1x256xi32>
    %84 = arith.andi %79, %83 : vector<1x256xi1>
    %cst_30 = arith.constant 0.000000e+00 : f32
    %85 = vector.shape_cast %84 : vector<1x256xi1> to vector<1x256xi1>
    %86 = vector.broadcast %85 : vector<1x256xi1> to vector<4x256xi1>
    %87 = vector.broadcast %cst_30 : f32 to vector<4x256xf32>
    %88 = arith.select %86, %65, %87 : vector<4x256xi1>, vector<4x256xf32>
    %89 = vector.extract_strided_slice %2 {offsets = [2, 0, 0], sizes = [1, 4, 1], strides = [1, 1, 1]} : vector<9x4x1xf32> to vector<1x4x1xf32>
    %90 = vector.shape_cast %89 : vector<1x4x1xf32> to vector<4x1xf32>
    %91 = vector.broadcast %90 : vector<4x1xf32> to vector<4x256xf32>
    %92 = arith.mulf %88, %91 : vector<4x256xf32>
    %93 = arith.addf %64, %92 : vector<4x256xf32>
    %c1_i32_31 = arith.constant 1 : i32
    %94 = tpu.dynamic_rotate %1 by %c1_i32_31 dim 1 : vector<4x256xf32>, i32 -> vector<4x256xf32>
    %c0_i32_32 = arith.constant 0 : i32
    %95 = vector.broadcast %c0_i32_32 : i32 to vector<1x256xi32>
    %96 = arith.addi %4, %95 : vector<1x256xi32>
    %c0_i32_33 = arith.constant 0 : i32
    %97 = vector.broadcast %c0_i32_33 : i32 to vector<1x256xi32>
    %98 = arith.cmpi sge, %96, %97 : vector<1x256xi32>
    %c0_i32_34 = arith.constant 0 : i32
    %99 = vector.broadcast %c0_i32_34 : i32 to vector<1x256xi32>
    %100 = arith.addi %4, %99 : vector<1x256xi32>
    %c16_i32_35 = arith.constant 16 : i32
    %101 = vector.broadcast %c16_i32_35 : i32 to vector<1x256xi32>
    %102 = arith.cmpi slt, %100, %101 : vector<1x256xi32>
    %103 = arith.andi %98, %102 : vector<1x256xi1>
    %c-1_i32_36 = arith.constant -1 : i32
    %104 = vector.broadcast %c-1_i32_36 : i32 to vector<1x256xi32>
    %105 = arith.addi %5, %104 : vector<1x256xi32>
    %c0_i32_37 = arith.constant 0 : i32
    %106 = vector.broadcast %c0_i32_37 : i32 to vector<1x256xi32>
    %107 = arith.cmpi sge, %105, %106 : vector<1x256xi32>
    %108 = arith.andi %103, %107 : vector<1x256xi1>
    %c-1_i32_38 = arith.constant -1 : i32
    %109 = vector.broadcast %c-1_i32_38 : i32 to vector<1x256xi32>
    %110 = arith.addi %5, %109 : vector<1x256xi32>
    %c16_i32_39 = arith.constant 16 : i32
    %111 = vector.broadcast %c16_i32_39 : i32 to vector<1x256xi32>
    %112 = arith.cmpi slt, %110, %111 : vector<1x256xi32>
    %113 = arith.andi %108, %112 : vector<1x256xi1>
    %cst_40 = arith.constant 0.000000e+00 : f32
    %114 = vector.shape_cast %113 : vector<1x256xi1> to vector<1x256xi1>
    %115 = vector.broadcast %114 : vector<1x256xi1> to vector<4x256xi1>
    %116 = vector.broadcast %cst_40 : f32 to vector<4x256xf32>
    %117 = arith.select %115, %94, %116 : vector<4x256xi1>, vector<4x256xf32>
    %118 = vector.extract_strided_slice %2 {offsets = [3, 0, 0], sizes = [1, 4, 1], strides = [1, 1, 1]} : vector<9x4x1xf32> to vector<1x4x1xf32>
    %119 = vector.shape_cast %118 : vector<1x4x1xf32> to vector<4x1xf32>
    %120 = vector.broadcast %119 : vector<4x1xf32> to vector<4x256xf32>
    %121 = arith.mulf %117, %120 : vector<4x256xf32>
    %122 = arith.addf %93, %121 : vector<4x256xf32>
    %c0_i32_41 = arith.constant 0 : i32
    %123 = vector.broadcast %c0_i32_41 : i32 to vector<1x256xi32>
    %124 = arith.addi %4, %123 : vector<1x256xi32>
    %c0_i32_42 = arith.constant 0 : i32
    %125 = vector.broadcast %c0_i32_42 : i32 to vector<1x256xi32>
    %126 = arith.cmpi sge, %124, %125 : vector<1x256xi32>
    %c0_i32_43 = arith.constant 0 : i32
    %127 = vector.broadcast %c0_i32_43 : i32 to vector<1x256xi32>
    %128 = arith.addi %4, %127 : vector<1x256xi32>
    %c16_i32_44 = arith.constant 16 : i32
    %129 = vector.broadcast %c16_i32_44 : i32 to vector<1x256xi32>
    %130 = arith.cmpi slt, %128, %129 : vector<1x256xi32>
    %131 = arith.andi %126, %130 : vector<1x256xi1>
    %c0_i32_45 = arith.constant 0 : i32
    %132 = vector.broadcast %c0_i32_45 : i32 to vector<1x256xi32>
    %133 = arith.addi %5, %132 : vector<1x256xi32>
    %c0_i32_46 = arith.constant 0 : i32
    %134 = vector.broadcast %c0_i32_46 : i32 to vector<1x256xi32>
    %135 = arith.cmpi sge, %133, %134 : vector<1x256xi32>
    %136 = arith.andi %131, %135 : vector<1x256xi1>
    %c0_i32_47 = arith.constant 0 : i32
    %137 = vector.broadcast %c0_i32_47 : i32 to vector<1x256xi32>
    %138 = arith.addi %5, %137 : vector<1x256xi32>
    %c16_i32_48 = arith.constant 16 : i32
    %139 = vector.broadcast %c16_i32_48 : i32 to vector<1x256xi32>
    %140 = arith.cmpi slt, %138, %139 : vector<1x256xi32>
    %141 = arith.andi %136, %140 : vector<1x256xi1>
    %cst_49 = arith.constant 0.000000e+00 : f32
    %142 = vector.shape_cast %141 : vector<1x256xi1> to vector<1x256xi1>
    %143 = vector.broadcast %142 : vector<1x256xi1> to vector<4x256xi1>
    %144 = vector.broadcast %cst_49 : f32 to vector<4x256xf32>
    %145 = arith.select %143, %1, %144 : vector<4x256xi1>, vector<4x256xf32>
    %146 = vector.extract_strided_slice %2 {offsets = [4, 0, 0], sizes = [1, 4, 1], strides = [1, 1, 1]} : vector<9x4x1xf32> to vector<1x4x1xf32>
    %147 = vector.shape_cast %146 : vector<1x4x1xf32> to vector<4x1xf32>
    %148 = vector.broadcast %147 : vector<4x1xf32> to vector<4x256xf32>
    %149 = arith.mulf %145, %148 : vector<4x256xf32>
    %150 = arith.addf %122, %149 : vector<4x256xf32>
    %c255_i32 = arith.constant 255 : i32
    %151 = tpu.dynamic_rotate %1 by %c255_i32 dim 1 : vector<4x256xf32>, i32 -> vector<4x256xf32>
    %c0_i32_50 = arith.constant 0 : i32
    %152 = vector.broadcast %c0_i32_50 : i32 to vector<1x256xi32>
    %153 = arith.addi %4, %152 : vector<1x256xi32>
    %c0_i32_51 = arith.constant 0 : i32
    %154 = vector.broadcast %c0_i32_51 : i32 to vector<1x256xi32>
    %155 = arith.cmpi sge, %153, %154 : vector<1x256xi32>
    %c0_i32_52 = arith.constant 0 : i32
    %156 = vector.broadcast %c0_i32_52 : i32 to vector<1x256xi32>
    %157 = arith.addi %4, %156 : vector<1x256xi32>
    %c16_i32_53 = arith.constant 16 : i32
    %158 = vector.broadcast %c16_i32_53 : i32 to vector<1x256xi32>
    %159 = arith.cmpi slt, %157, %158 : vector<1x256xi32>
    %160 = arith.andi %155, %159 : vector<1x256xi1>
    %c1_i32_54 = arith.constant 1 : i32
    %161 = vector.broadcast %c1_i32_54 : i32 to vector<1x256xi32>
    %162 = arith.addi %5, %161 : vector<1x256xi32>
    %c0_i32_55 = arith.constant 0 : i32
    %163 = vector.broadcast %c0_i32_55 : i32 to vector<1x256xi32>
    %164 = arith.cmpi sge, %162, %163 : vector<1x256xi32>
    %165 = arith.andi %160, %164 : vector<1x256xi1>
    %c1_i32_56 = arith.constant 1 : i32
    %166 = vector.broadcast %c1_i32_56 : i32 to vector<1x256xi32>
    %167 = arith.addi %5, %166 : vector<1x256xi32>
    %c16_i32_57 = arith.constant 16 : i32
    %168 = vector.broadcast %c16_i32_57 : i32 to vector<1x256xi32>
    %169 = arith.cmpi slt, %167, %168 : vector<1x256xi32>
    %170 = arith.andi %165, %169 : vector<1x256xi1>
    %cst_58 = arith.constant 0.000000e+00 : f32
    %171 = vector.shape_cast %170 : vector<1x256xi1> to vector<1x256xi1>
    %172 = vector.broadcast %171 : vector<1x256xi1> to vector<4x256xi1>
    %173 = vector.broadcast %cst_58 : f32 to vector<4x256xf32>
    %174 = arith.select %172, %151, %173 : vector<4x256xi1>, vector<4x256xf32>
    %175 = vector.extract_strided_slice %2 {offsets = [5, 0, 0], sizes = [1, 4, 1], strides = [1, 1, 1]} : vector<9x4x1xf32> to vector<1x4x1xf32>
    %176 = vector.shape_cast %175 : vector<1x4x1xf32> to vector<4x1xf32>
    %177 = vector.broadcast %176 : vector<4x1xf32> to vector<4x256xf32>
    %178 = arith.mulf %174, %177 : vector<4x256xf32>
    %179 = arith.addf %150, %178 : vector<4x256xf32>
    %c241_i32 = arith.constant 241 : i32
    %180 = tpu.dynamic_rotate %1 by %c241_i32 dim 1 : vector<4x256xf32>, i32 -> vector<4x256xf32>
    %c1_i32_59 = arith.constant 1 : i32
    %181 = vector.broadcast %c1_i32_59 : i32 to vector<1x256xi32>
    %182 = arith.addi %4, %181 : vector<1x256xi32>
    %c0_i32_60 = arith.constant 0 : i32
    %183 = vector.broadcast %c0_i32_60 : i32 to vector<1x256xi32>
    %184 = arith.cmpi sge, %182, %183 : vector<1x256xi32>
    %c1_i32_61 = arith.constant 1 : i32
    %185 = vector.broadcast %c1_i32_61 : i32 to vector<1x256xi32>
    %186 = arith.addi %4, %185 : vector<1x256xi32>
    %c16_i32_62 = arith.constant 16 : i32
    %187 = vector.broadcast %c16_i32_62 : i32 to vector<1x256xi32>
    %188 = arith.cmpi slt, %186, %187 : vector<1x256xi32>
    %189 = arith.andi %184, %188 : vector<1x256xi1>
    %c-1_i32_63 = arith.constant -1 : i32
    %190 = vector.broadcast %c-1_i32_63 : i32 to vector<1x256xi32>
    %191 = arith.addi %5, %190 : vector<1x256xi32>
    %c0_i32_64 = arith.constant 0 : i32
    %192 = vector.broadcast %c0_i32_64 : i32 to vector<1x256xi32>
    %193 = arith.cmpi sge, %191, %192 : vector<1x256xi32>
    %194 = arith.andi %189, %193 : vector<1x256xi1>
    %c-1_i32_65 = arith.constant -1 : i32
    %195 = vector.broadcast %c-1_i32_65 : i32 to vector<1x256xi32>
    %196 = arith.addi %5, %195 : vector<1x256xi32>
    %c16_i32_66 = arith.constant 16 : i32
    %197 = vector.broadcast %c16_i32_66 : i32 to vector<1x256xi32>
    %198 = arith.cmpi slt, %196, %197 : vector<1x256xi32>
    %199 = arith.andi %194, %198 : vector<1x256xi1>
    %cst_67 = arith.constant 0.000000e+00 : f32
    %200 = vector.shape_cast %199 : vector<1x256xi1> to vector<1x256xi1>
    %201 = vector.broadcast %200 : vector<1x256xi1> to vector<4x256xi1>
    %202 = vector.broadcast %cst_67 : f32 to vector<4x256xf32>
    %203 = arith.select %201, %180, %202 : vector<4x256xi1>, vector<4x256xf32>
    %204 = vector.extract_strided_slice %2 {offsets = [6, 0, 0], sizes = [1, 4, 1], strides = [1, 1, 1]} : vector<9x4x1xf32> to vector<1x4x1xf32>
    %205 = vector.shape_cast %204 : vector<1x4x1xf32> to vector<4x1xf32>
    %206 = vector.broadcast %205 : vector<4x1xf32> to vector<4x256xf32>
    %207 = arith.mulf %203, %206 : vector<4x256xf32>
    %208 = arith.addf %179, %207 : vector<4x256xf32>
    %c240_i32 = arith.constant 240 : i32
    %209 = tpu.dynamic_rotate %1 by %c240_i32 dim 1 : vector<4x256xf32>, i32 -> vector<4x256xf32>
    %c1_i32_68 = arith.constant 1 : i32
    %210 = vector.broadcast %c1_i32_68 : i32 to vector<1x256xi32>
    %211 = arith.addi %4, %210 : vector<1x256xi32>
    %c0_i32_69 = arith.constant 0 : i32
    %212 = vector.broadcast %c0_i32_69 : i32 to vector<1x256xi32>
    %213 = arith.cmpi sge, %211, %212 : vector<1x256xi32>
    %c1_i32_70 = arith.constant 1 : i32
    %214 = vector.broadcast %c1_i32_70 : i32 to vector<1x256xi32>
    %215 = arith.addi %4, %214 : vector<1x256xi32>
    %c16_i32_71 = arith.constant 16 : i32
    %216 = vector.broadcast %c16_i32_71 : i32 to vector<1x256xi32>
    %217 = arith.cmpi slt, %215, %216 : vector<1x256xi32>
    %218 = arith.andi %213, %217 : vector<1x256xi1>
    %c0_i32_72 = arith.constant 0 : i32
    %219 = vector.broadcast %c0_i32_72 : i32 to vector<1x256xi32>
    %220 = arith.addi %5, %219 : vector<1x256xi32>
    %c0_i32_73 = arith.constant 0 : i32
    %221 = vector.broadcast %c0_i32_73 : i32 to vector<1x256xi32>
    %222 = arith.cmpi sge, %220, %221 : vector<1x256xi32>
    %223 = arith.andi %218, %222 : vector<1x256xi1>
    %c0_i32_74 = arith.constant 0 : i32
    %224 = vector.broadcast %c0_i32_74 : i32 to vector<1x256xi32>
    %225 = arith.addi %5, %224 : vector<1x256xi32>
    %c16_i32_75 = arith.constant 16 : i32
    %226 = vector.broadcast %c16_i32_75 : i32 to vector<1x256xi32>
    %227 = arith.cmpi slt, %225, %226 : vector<1x256xi32>
    %228 = arith.andi %223, %227 : vector<1x256xi1>
    %cst_76 = arith.constant 0.000000e+00 : f32
    %229 = vector.shape_cast %228 : vector<1x256xi1> to vector<1x256xi1>
    %230 = vector.broadcast %229 : vector<1x256xi1> to vector<4x256xi1>
    %231 = vector.broadcast %cst_76 : f32 to vector<4x256xf32>
    %232 = arith.select %230, %209, %231 : vector<4x256xi1>, vector<4x256xf32>
    %233 = vector.extract_strided_slice %2 {offsets = [7, 0, 0], sizes = [1, 4, 1], strides = [1, 1, 1]} : vector<9x4x1xf32> to vector<1x4x1xf32>
    %234 = vector.shape_cast %233 : vector<1x4x1xf32> to vector<4x1xf32>
    %235 = vector.broadcast %234 : vector<4x1xf32> to vector<4x256xf32>
    %236 = arith.mulf %232, %235 : vector<4x256xf32>
    %237 = arith.addf %208, %236 : vector<4x256xf32>
    %c239_i32 = arith.constant 239 : i32
    %238 = tpu.dynamic_rotate %1 by %c239_i32 dim 1 : vector<4x256xf32>, i32 -> vector<4x256xf32>
    %c1_i32_77 = arith.constant 1 : i32
    %239 = vector.broadcast %c1_i32_77 : i32 to vector<1x256xi32>
    %240 = arith.addi %4, %239 : vector<1x256xi32>
    %c0_i32_78 = arith.constant 0 : i32
    %241 = vector.broadcast %c0_i32_78 : i32 to vector<1x256xi32>
    %242 = arith.cmpi sge, %240, %241 : vector<1x256xi32>
    %c1_i32_79 = arith.constant 1 : i32
    %243 = vector.broadcast %c1_i32_79 : i32 to vector<1x256xi32>
    %244 = arith.addi %4, %243 : vector<1x256xi32>
    %c16_i32_80 = arith.constant 16 : i32
    %245 = vector.broadcast %c16_i32_80 : i32 to vector<1x256xi32>
    %246 = arith.cmpi slt, %244, %245 : vector<1x256xi32>
    %247 = arith.andi %242, %246 : vector<1x256xi1>
    %c1_i32_81 = arith.constant 1 : i32
    %248 = vector.broadcast %c1_i32_81 : i32 to vector<1x256xi32>
    %249 = arith.addi %5, %248 : vector<1x256xi32>
    %c0_i32_82 = arith.constant 0 : i32
    %250 = vector.broadcast %c0_i32_82 : i32 to vector<1x256xi32>
    %251 = arith.cmpi sge, %249, %250 : vector<1x256xi32>
    %252 = arith.andi %247, %251 : vector<1x256xi1>
    %c1_i32_83 = arith.constant 1 : i32
    %253 = vector.broadcast %c1_i32_83 : i32 to vector<1x256xi32>
    %254 = arith.addi %5, %253 : vector<1x256xi32>
    %c16_i32_84 = arith.constant 16 : i32
    %255 = vector.broadcast %c16_i32_84 : i32 to vector<1x256xi32>
    %256 = arith.cmpi slt, %254, %255 : vector<1x256xi32>
    %257 = arith.andi %252, %256 : vector<1x256xi1>
    %cst_85 = arith.constant 0.000000e+00 : f32
    %258 = vector.shape_cast %257 : vector<1x256xi1> to vector<1x256xi1>
    %259 = vector.broadcast %258 : vector<1x256xi1> to vector<4x256xi1>
    %260 = vector.broadcast %cst_85 : f32 to vector<4x256xf32>
    %261 = arith.select %259, %238, %260 : vector<4x256xi1>, vector<4x256xf32>
    %262 = vector.extract_strided_slice %2 {offsets = [8, 0, 0], sizes = [1, 4, 1], strides = [1, 1, 1]} : vector<9x4x1xf32> to vector<1x4x1xf32>
    %263 = vector.shape_cast %262 : vector<1x4x1xf32> to vector<4x1xf32>
    %264 = vector.broadcast %263 : vector<4x1xf32> to vector<4x256xf32>
    %265 = arith.mulf %261, %264 : vector<4x256xf32>
    %266 = arith.addf %237, %265 : vector<4x256xf32>
    %c0_86 = arith.constant 0 : index
    %c0_87 = arith.constant 0 : index
    %c0_88 = arith.constant 0 : index
    %267 = vector.load %arg4[%c0_86, %c0_87, %c0_88] : memref<4x8x1xf32, #tpu.memory_space<vmem>>, vector<4x8x1xf32>
    %cst_89 = arith.constant 0.000000e+00 : f32
    %268 = vector.broadcast %cst_89 : f32 to vector<8x256xf32>
    %269 = vector.extract_strided_slice %266 {offsets = [0, 0], sizes = [1, 256], strides = [1, 1]} : vector<4x256xf32> to vector<1x256xf32>
    %270 = vector.extract_strided_slice %267 {offsets = [0, 0, 0], sizes = [1, 8, 1], strides = [1, 1, 1]} : vector<4x8x1xf32> to vector<1x8x1xf32>
    %271 = vector.shape_cast %270 : vector<1x8x1xf32> to vector<8x1xf32>
    %272 = vector.broadcast %269 : vector<1x256xf32> to vector<8x256xf32>
    %273 = vector.broadcast %271 : vector<8x1xf32> to vector<8x256xf32>
    %274 = arith.mulf %272, %273 : vector<8x256xf32>
    %275 = arith.addf %268, %274 : vector<8x256xf32>
    %276 = vector.extract_strided_slice %266 {offsets = [1, 0], sizes = [1, 256], strides = [1, 1]} : vector<4x256xf32> to vector<1x256xf32>
    %277 = vector.extract_strided_slice %267 {offsets = [1, 0, 0], sizes = [1, 8, 1], strides = [1, 1, 1]} : vector<4x8x1xf32> to vector<1x8x1xf32>
    %278 = vector.shape_cast %277 : vector<1x8x1xf32> to vector<8x1xf32>
    %279 = vector.broadcast %276 : vector<1x256xf32> to vector<8x256xf32>
    %280 = vector.broadcast %278 : vector<8x1xf32> to vector<8x256xf32>
    %281 = arith.mulf %279, %280 : vector<8x256xf32>
    %282 = arith.addf %275, %281 : vector<8x256xf32>
    %283 = vector.extract_strided_slice %266 {offsets = [2, 0], sizes = [1, 256], strides = [1, 1]} : vector<4x256xf32> to vector<1x256xf32>
    %284 = vector.extract_strided_slice %267 {offsets = [2, 0, 0], sizes = [1, 8, 1], strides = [1, 1, 1]} : vector<4x8x1xf32> to vector<1x8x1xf32>
    %285 = vector.shape_cast %284 : vector<1x8x1xf32> to vector<8x1xf32>
    %286 = vector.broadcast %283 : vector<1x256xf32> to vector<8x256xf32>
    %287 = vector.broadcast %285 : vector<8x1xf32> to vector<8x256xf32>
    %288 = arith.mulf %286, %287 : vector<8x256xf32>
    %289 = arith.addf %282, %288 : vector<8x256xf32>
    %290 = vector.extract_strided_slice %266 {offsets = [3, 0], sizes = [1, 256], strides = [1, 1]} : vector<4x256xf32> to vector<1x256xf32>
    %291 = vector.extract_strided_slice %267 {offsets = [3, 0, 0], sizes = [1, 8, 1], strides = [1, 1, 1]} : vector<4x8x1xf32> to vector<1x8x1xf32>
    %292 = vector.shape_cast %291 : vector<1x8x1xf32> to vector<8x1xf32>
    %293 = vector.broadcast %290 : vector<1x256xf32> to vector<8x256xf32>
    %294 = vector.broadcast %292 : vector<8x1xf32> to vector<8x256xf32>
    %295 = arith.mulf %293, %294 : vector<8x256xf32>
    %296 = arith.addf %289, %295 : vector<8x256xf32>
    %c0_90 = arith.constant 0 : index
    %c0_91 = arith.constant 0 : index
    %c0_92 = arith.constant 0 : index
    %297 = vector.load %arg5[%c0_90, %c0_91, %c0_92] : memref<1x8x256xf32, #tpu.memory_space<vmem>>, vector<1x8x256xf32>
    %298 = vector.shape_cast %297 : vector<1x8x256xf32> to vector<8x256xf32>
    %299 = vector.shape_cast %296 : vector<8x256xf32> to vector<1x8x256xf32>
    tpu.vector_store %arg5[%c0_90, %c0_91, %c0_92], %299 {strides = array<i32>} : memref<1x8x256xf32, #tpu.memory_space<vmem>>, vector<1x8x256xf32>,
    return
  }
  func.func @transform_0(%arg0: i32) -> (i32, i32, i32) {
    %c0_i32 = arith.constant 0 : i32
    %c0_i32_0 = arith.constant 0 : i32
    %c0_i32_1 = arith.constant 0 : i32
    return %arg0, %c0_i32, %c0_i32_0 : i32, i32, i32
  }
  func.func @transform_1(%arg0: i32) -> (i32, i32) {
    %c0_i32 = arith.constant 0 : i32
    %c0_i32_0 = arith.constant 0 : i32
    %c0_i32_1 = arith.constant 0 : i32
    return %c0_i32, %c0_i32_0 : i32, i32
  }
  func.func @transform_2(%arg0: i32) -> (i32, i32, i32) {
    %c0_i32 = arith.constant 0 : i32
    %c0_i32_0 = arith.constant 0 : i32
    %c0_i32_1 = arith.constant 0 : i32
    %c0_i32_2 = arith.constant 0 : i32
    return %c0_i32, %c0_i32_0, %c0_i32_1 : i32, i32, i32
  }
  func.func @transform_3(%arg0: i32) -> (i32, i32, i32) {
    %c0_i32 = arith.constant 0 : i32
    %c0_i32_0 = arith.constant 0 : i32
    %c0_i32_1 = arith.constant 0 : i32
    %c0_i32_2 = arith.constant 0 : i32
    return %c0_i32, %c0_i32_0, %c0_i32_1 : i32, i32, i32
  }
  func.func @transform_4(%arg0: i32) -> (i32, i32, i32) {
    %c0_i32 = arith.constant 0 : i32
    %c0_i32_0 = arith.constant 0 : i32
    %c0_i32_1 = arith.constant 0 : i32
    return %arg0, %c0_i32, %c0_i32_0 : i32, i32, i32
  }
}

</mosaic_0001>

<bundles_post_ra>
// kernel: depthwise_separable_conv.1
= control target key start
LH: loop header
LB: loop body
LE: loop exit
PB: predicated region body
PF: predicated region fallthrough
CT: control target
= control target key end

     0   :  { %s803_s15 = smov 0   ;;  %s1065_s0 = inlined_call_operand.vmem [shape: f32[2,4,256], index: 0, kind: input, shape index: {}]   ;;  %s1066_s1 = inlined_call_operand.vmem [shape: s32[2,256], index: 1, kind: input, shape index: {}]   ;;  %s1067_s2 = inlined_call_operand.vmem [shape: f32[9,4,1], index: 2, kind: input, shape index: {}]   ;;  %s1068_s3 = inlined_call_operand.vmem [shape: f32[4,8,1], index: 3, kind: input, shape index: {}]   ;;  %s1069_s4 = inlined_call_operand.vmem [shape: f32[2,8,256], index: 4, kind: output, shape index: {}]  }
   0x1 LB: > { %s722_s16 = sadd.s32 4294967295, %s767_s15   ;;  %p726_p0 = scmp.ge.s32.totalorder %s767_s15, 1  ;;  %s767_s15 = sphi %s803_s15, %s14_s15  }
   0x2   : > { %p162_p1 = scmp.lt.s32.totalorder %s767_s15, 3 }
   0x4   : > { %p163_p2 = pnand %p726_p0, %p162_p1 }
   0x5   : > { %p188_p3 = scmp.lt.s32.totalorder (!%p163_p2), %s722_s16, 1  ;;  %s770_s29 = smov (!%p163_p2), 17  }
   0x6   : > { %166 = sbr.rel (%p163_p2) target bundleno = 202 (0xca), region = 36  ;;  %s771_s30 = smov (!%p163_p2), 16  }
   0x7   : > { %s772_s7 = smov (!%p163_p2), 15   ;;  %s773_s10 = smov (!%p163_p2), 1  }
   0x8   : > { %s774_s17 = smov (!%p163_p2), 127   ;;  %s775_s20 = smov (!%p163_p2), 113  }
   0x9   : > { %s777_s24 = smov (!%p163_p2), 111  }
   0xb   : > { %v201_v0 = vld [vmem:[%s1067_s2 + $0x8] sm:$0xf]  ;;  %v199_v1 = vld [vmem:[%s1067_s2] sm:$0xf]  ;;  %v769_v2 = vmov 0   ;;  %s1095_s16 = smov (!%p188_p3, %s722_s16), 1  ;;  %v216_v11 = vlaneseq }
   0xc   : > { %759 = vset.pattern.permute.xlu1 %v769_v2  ;;  %758 = vset.pattern.permute.xlu0 %v769_v2  ;;  %v200_v3 = vld [vmem:[%s1067_s2 + $0x4] sm:$0xf]  ;;  %s739_s23 = sshll.u32 %s1095_s16, 3  ;;  %v831_v4 = vld [vmem:[%s1066_s1] sm:$0xf]  ;;  %v1075_v14 = vmov 0 }
   0xd   : > { %357 = vperm.xlu1 %759, %v201_v0   ;;  %258 = vperm.xlu0 %758, %v199_v1   ;;  %s192_s26 = scalar_lea.vmem %s1065_s0, %s739_s23  ;;  %vm272_vm0 = vcmp.ge.s32.totalorder %v831_v4, 0  ;;  %vm278_vm1 = vcmp.lt.s32.totalorder %v831_v4, 16  ;;  %v202_v10 = vld [vmem:[%s1067_s2 + $0xc] sm:$0xf]  ;;  %v849_v15 = vshrl.u32 %v216_v11, 7  ;;  %v1077_v16 = vmov 0 }
   0xe   : > { %v198_v5 = vld [vmem:[%s192_s26] sm:$0xff]  ;;  %v273_v7 = vsel %vm272_vm0, 1, %v769_v2  ;;  %v279_v9 = vsel %vm278_vm1, 1, %v769_v2  ;;  %vm840_vm2 = vmand %vm272_vm0, %vm278_vm1  ;;  %v203_v17 = vld [vmem:[%s1067_s2 + $0x10] sm:$0xf]  ;;  %s776_s23 = smov 112  }
   0xf   : > { %v210_v6 = vcombine.high %v198_v5, %v198_v5  ;;  %v733_v8 = vrot.slane %v273_v7, 9  ;;  %v734_v13 = vrot.slane %v279_v9, 9  ;;  %v865_v18 = vsub.s32 0, %v849_v15  ;;  %v204_v23 = vld [vmem:[%s1067_s2 + $0x14] sm:$0xf]  ;;  %v593_v31 = vld [vmem:[%s1068_s3] sm:$0xff] }
  0x10   : > { %v868_v19 = vsub.s32 2, %v849_v15  ;;  %v205_v26 = vld [vmem:[%s1067_s2 + $0x18] sm:$0xf]  ;;  %v206_v29 = vld [vmem:[%s1067_s2 + $0x1c] sm:$0xf]  ;;  %v594_v32 = vld [vmem:[%s1068_s3 + $0x8] sm:$0xff] }
  0x11   : > { %307 = vperm.xlu0 %758, %v200_v3   ;;  %212 = vrot.lane.b32.xlu1 %v198_v5, %s770_s29  ;;  %vm844_vm3 = vcmp.ne.s32.totalorder %v733_v8, 0  ;;  %vm855_vm5 = vcmp.ne.s32.totalorder %v734_v13, 0  ;;  %v207_v30 = vld [vmem:[%s1067_s2 + $0x20] sm:$0xf]  ;;  %v595_v33 = vld [vmem:[%s1068_s3 + $0x10] sm:$0xff]  ;;  %v596_v34 = vld [vmem:[%s1068_s3 + $0x18] sm:$0xff] }
  0x12   : > { %v1076_v14 = vsel %vm844_vm3, 4294967295, %v1075_v14  ;;  %vm404_vm4 = vmand %vm840_vm2, %vm844_vm3  ;;  %v1078_v16 = vsel %vm855_vm5, 4294967295, %v1077_v16  ;;  %v221_v35 = vadd.s32 4294967295, %v831_v4  ;;  %v321_v36 = vadd.s32 1, %v831_v4 }
  0x13   : > { %vm405_vm6 = vmand %vm404_vm4, %vm855_vm5  ;;  %v1081_v46 = vmov 0  ;;  %v959_v0 = vand.u32 127, %v216_v11 }
  0x14   : > { %v406_v20 = vsel %vm405_vm6, 1, %v769_v2  ;;  %vm222_vm9 = vcmp.ge.s32.totalorder %v221_v35, 0  ;;  %vm322_vm10 = vcmp.ge.s32.totalorder %v321_v36, 0  ;;  %vm223_vm11 = vcmp.lt.s32.totalorder %v221_v35, 16 }
  0x15   : > { %214 = vrot.lane.b32.xlu0 %v210_v6, %s770_s29  ;;  %265 = vrot.lane.b32.xlu1 %v198_v5, %s771_s30  ;;  %v410_v21 = vrot.slane %v406_v20, %v865_v18  ;;  %v414_v22 = vrot.slane %v406_v20, %v868_v19  ;;  %v225_v37 = vsel %vm222_vm9, 1, %v769_v2  ;;  %v323_v38 = vsel %vm322_vm10, 1, %v769_v2  ;;  %vm224_vm13 = vmand %vm222_vm9, %vm223_vm11 }
  0x16   : > { %vm328_vm12 = vcmp.lt.s32.totalorder %v321_v36, 16  ;;  %v731_v39 = vrot.slane %v225_v37, 9  ;;  %v230_v40 = vsel %vm223_vm11, 1, %v769_v2  ;;  %v735_v41 = vrot.slane %v323_v38, 9  ;;  %vm277_vm4 = vmand %vm224_vm13, %vm844_vm3 }
  0x17   : > { %v418_v24 = vrot.slane %v410_v21, %v865_v18  ;;  %v422_v25 = vrot.slane %v414_v22, %v865_v18  ;;  %v329_v42 = vsel %vm328_vm12, 1, %v769_v2  ;;  %v732_v43 = vrot.slane %v230_v40, 9  ;;  %vm283_vm9 = vmand %vm277_vm4, %vm855_vm5 }
  0x18   : > { %vm911_vm14 = vcmp.ne.s32.totalorder %v731_v39, 0  ;;  %v736_v45 = vrot.slane %v329_v42, 9  ;;  %vm915_vm15 = vcmp.ne.s32.totalorder %v735_v41, 0  ;;  %v284_v53 = vsel %vm283_vm9, 1, %v769_v2 }
  0x19   : > { %267 = vrot.lane.b32.xlu0 %v210_v6, %s771_s30  ;;  %397 = vperm.xlu1 %759, %v202_v10   ;;  %vm423_vm7 = vcmp.eq.s32.totalorder %v418_v24, 1  ;;  %vm424_vm8 = vcmp.eq.s32.totalorder %v422_v25, 1  ;;  %v1082_v46 = vsel %vm915_vm15, 4294967295, %v1081_v46  ;;  %vm229_vm0 = vmand %vm224_vm13, %vm911_vm14  ;;  %vm921_vm1 = vcmp.ne.s32.totalorder %v732_v43, 0 }
  0x1a   : > { %v881_v27 = vsel %vm423_vm7, %v198_v5, 0.0  ;;  %v883_v28 = vsel %vm424_vm8, %v210_v6, 0.0  ;;  %vm327_vm6 = vmand %vm224_vm13, %vm915_vm15  ;;  %vm929_vm7 = vcmp.ne.s32.totalorder %v736_v45, 0  ;;  %v288_v56 = vrot.slane %v284_v53, %v865_v18 }
  0x1b   : > { %vm234_vm8 = vmand %vm229_vm0, %vm921_vm1  ;;  %v292_v57 = vrot.slane %v284_v53, %v868_v19  ;;  %vm269_vm4 = vcmp.lt.s32.totalorder %v959_v0, 16 }
  0x1c   : > { %vm333_vm11 = vmand %vm327_vm6, %vm929_vm7  ;;  %v235_v54 = vsel %vm234_vm8, 1, %v769_v2  ;;  %v296_v3 = vrot.slane %v288_v56, %v865_v18  ;;  %vm218_vm8 = vcmp.lt.s32.totalorder %v959_v0, 17 }
  0x1d   : > { %314 = vrot.lane.b32.xlu0 %v198_v5, %s772_s7  ;;  %316 = vrot.lane.b32.xlu1 %v210_v6, %s772_s7  ;;  %vm372_vm13 = vmand %vm840_vm2, %vm911_vm14  ;;  %v334_v55 = vsel %vm333_vm11, 1, %v769_v2  ;;  %v239_v59 = vrot.slane %v235_v54, %v865_v18  ;;  %v243_v60 = vrot.slane %v235_v54, %v868_v19  ;;  %v300_v4 = vrot.slane %v292_v57, %v865_v18  ;;  %s740_s7 = sshll.u32 %s1095_s16, 4 }
  0x1e   : > { %vm373_vm0 = vmand %vm372_vm13, %vm921_vm1  ;;  %v338_v62 = vrot.slane %v334_v55, %v865_v18  ;;  %v342_v63 = vrot.slane %v334_v55, %v868_v19  ;;  %vm301_vm11 = vcmp.eq.s32.totalorder %v296_v3, 1 }
  0x1f   : > { %v374_v1 = vsel %vm373_vm0, 1, %v769_v2  ;;  %vm443_vm6 = vmand %vm840_vm2, %vm915_vm15  ;;  %vm302_vm13 = vcmp.eq.s32.totalorder %v300_v4, 1 }
  0x20   : > { %v346_v8 = vrot.slane %v338_v62, %v865_v18  ;;  %v350_v9 = vrot.slane %v342_v63, %v865_v18  ;;  %v378_v11 = vrot.slane %v374_v1, %v865_v18  ;;  %v382_v13 = vrot.slane %v374_v1, %v868_v19  ;;  %vm983_vm0 = vmand %vm322_vm10, %vm328_vm12 }
  0x21   : > { %429 = vperm.xlu0 %758, %v203_v17   ;;  %364 = vrot.lane.b32.xlu1 %v198_v5, %s773_s10  ;;  %vm444_vm9 = vmand %vm443_vm6, %vm929_vm7  ;;  %vm1089_vm10 = vcmp.lt.s32.totalorder %v959_v0, 15  ;;  %vm368_vm6 = vcmp.lt.s32.totalorder %v959_v0, 1 }
  0x22   : > { %vm351_vm15 = vcmp.eq.s32.totalorder %v346_v8, 1  ;;  %vm352_vm3 = vcmp.eq.s32.totalorder %v350_v9, 1  ;;  %v386_v25 = vrot.slane %v378_v11, %v865_v18  ;;  %vm1090_vm12 = vmmov %vm1089_vm10 }
  0x25   : > { %366 = vrot.lane.b32.xlu0 %v210_v6, %s773_s10  ;;  %468 = vperm.xlu1 %759, %v204_v23   ;;  %s197_s10 = scalar_lea.vmem %s1069_s4, %s740_s7 }
  0x29   : > { %508 = vperm.xlu0 %758, %v205_v26   ;;  %436 = vrot.lane.b32.xlu1 %v198_v5, %s774_s17  ;;  %v390_v26 = vrot.slane %v382_v13, %v865_v18 }
  0x2d   : > { %438 = vrot.lane.b32.xlu0 %v210_v6, %s774_s17  ;;  %547 = vperm.xlu1 %759, %v206_v29  }
  0x31   : > { %475 = vrot.lane.b32.xlu0 %v198_v5, %s775_s20  ;;  %477 = vrot.lane.b32.xlu1 %v210_v6, %s775_s20 }
  0x35   : > { %586 = vperm.xlu0 %758, %v207_v30   ;;  %515 = vrot.lane.b32.xlu1 %v198_v5, %s776_s23 }
  0x39   : > { %517 = vrot.lane.b32.xlu0 %v210_v6, %s776_s23  ;;  %554 = vrot.lane.b32.xlu1 %v198_v5, %s777_s24  ;;  %v247_v5 = vrot.slane %v239_v59, %v865_v18 }
  0x3b   : > { %vm252_vm5 = vcmp.eq.s32.totalorder %v247_v5, 1 }
  0x3d   : > { %556 = vrot.lane.b32.xlu0 %v210_v6, %s777_s24  ;;  %607 = vperm.xlu1 %759, %v593_v31   ;;  %v251_v6 = vrot.slane %v243_v60, %v865_v18 }
  0x3f   : > { %vm253_vm2 = vcmp.eq.s32.totalorder %v251_v6, 1 }
  0x41   : > { %624 = vperm.xlu0 %758, %v594_v32   ;;  %641 = vperm.xlu1 %759, %v595_v33   ;;  %v445_v33 = vsel %vm444_vm9, 1, %v769_v2  ;;  %vm440_vm9 = vcmp.lt.s32.totalorder %v959_v0, 127 }
  0x42   : > { %v449_v42 = vrot.slane %v445_v33, %v865_v18  ;;  %v453_v43 = vrot.slane %v445_v33, %v868_v19 }
  0x44   : > { %v457_v60 = vrot.slane %v449_v42, %v865_v18 }
  0x45   : > { %658 = vperm.xlu0 %758, %v596_v34  }
  0x88   : > { %v933_v49 = vpop.permute.xlu1 %357  ;;  %v935_v50 = vpop.permute.xlu0 %258 }
  0x8c   : > { %v308_v51 = vpop.permute.xlu0 %307  ;;  %v213_v52 = vpop.permute.xlu1 %212 }
  0x90   : > { %v266_v58 = vpop.permute.xlu1 %265  ;;  %v215_v61 = vpop.permute.xlu0 %214 }
  0x91   : > { %v219_v22 = vsel %vm218_vm8, %v213_v52, %v215_v61  ;;  %v220_v23 = vsel %vm218_vm8, %v215_v61, %v213_v52 }
  0x92   : > { %v254_v34 = vsel %vm252_vm5, %v220_v23, 0.0  ;;  %v255_v35 = vsel %vm253_vm2, %v219_v22, 0.0  ;;  %vm1093_vm2 = vnez %v1082_v46 }
  0x93   : > { %v261_v44 = vmul.f32 %v935_v50, %v254_v34  ;;  %v262_v45 = vmul.f32 %v935_v50, %v255_v35 }
  0x94   : > { %v268_v7 = vpop.permute.xlu0 %267  ;;  %v398_v10 = vpop.permute.xlu1 %397 }
  0x95   : > { %v270_v17 = vsel %vm269_vm4, %v266_v58, %v268_v7  ;;  %v271_v20 = vsel %vm269_vm4, %v268_v7, %v266_v58  ;;  %vm483_vm4 = vmand %vm983_vm0, %vm911_vm14  ;;  %vm391_vm14 = vcmp.eq.s32.totalorder %v386_v25, 1 }
  0x96   : > { %v303_v29 = vsel %vm301_vm11, %v271_v20, 0.0  ;;  %v304_v30 = vsel %vm302_vm13, %v270_v17, 0.0  ;;  %vm484_vm8 = vmand %vm483_vm4, %vm921_vm1  ;;  %vm392_vm11 = vcmp.eq.s32.totalorder %v390_v26, 1  ;;  %vm462_vm13 = vcmp.eq.s32.totalorder %v457_v60, 1 }
  0x97   : > { %v310_v39 = vmul.f32 %v308_v51, %v303_v29  ;;  %v311_v40 = vmul.f32 %v308_v51, %v304_v30  ;;  %v485_v54 = vsel %vm484_vm8, 1, %v769_v2 }
  0x98   : > { %v315_v12 = vpop.permute.xlu0 %314  ;;  %v317_v24 = vpop.permute.xlu1 %316  ;;  %v489_v4 = vrot.slane %v485_v54, %v865_v18 }
  0x99   : > { %v319_v31 = vsel %vm1089_vm10, %v315_v12, %v317_v24  ;;  %v320_v32 = vsel %vm1090_vm12, %v317_v24, %v315_v12  ;;  %v312_v55 = vadd.f32 %v310_v39, %v261_v44  ;;  %v313_v47 = vadd.f32 %v311_v40, %v262_v45  ;;  %vm561_vm10 = vmand %vm983_vm0, %vm1093_vm2 }
  0x9a   : > { %v353_v36 = vsel %vm351_vm15, %v320_v32, 0.0  ;;  %v354_v37 = vsel %vm352_vm3, %v319_v31, 0.0  ;;  %vm1091_vm3 = vnez %v1076_v14  ;;  %v493_v14 = vrot.slane %v485_v54, %v868_v19  ;;  %vm562_vm4 = vmand %vm561_vm10, %vm929_vm7 }
  0x9b   : > { %v360_v52 = vmul.f32 %v933_v49, %v353_v36  ;;  %v361_v51 = vmul.f32 %v933_v49, %v354_v37  ;;  %vm522_vm5 = vmand %vm983_vm0, %vm1091_vm3  ;;  %v461_v49 = vrot.slane %v453_v43, %v865_v18  ;;  %vm1092_vm15 = vnez %v1078_v16 }
  0x9c   : > { %v430_v38 = vpop.permute.xlu0 %429  ;;  %v365_v41 = vpop.permute.xlu1 %364  ;;  %vm523_vm1 = vmand %vm522_vm5, %vm1092_vm15  ;;  %vm479_vm0 = vcmp.lt.s32.totalorder %v959_v0, 113  ;;  %v563_v29 = vsel %vm562_vm4, 1, %v769_v2  ;;  %vm519_vm7 = vcmp.lt.s32.totalorder %v959_v0, 112  ;;  %vm558_vm3 = vcmp.lt.s32.totalorder %v959_v0, 111 }
  0x9d   : > { %v362_v61 = vadd.f32 %v360_v52, %v312_v55  ;;  %v363_v62 = vadd.f32 %v361_v51, %v313_v47  ;;  %v432_v5 = vmul.f32 %v430_v38, %v881_v27  ;;  %v433_v6 = vmul.f32 %v430_v38, %v883_v28 }
  0x9e   : > { %vm463_vm12 = vcmp.eq.s32.totalorder %v461_v49, 1  ;;  %v524_v16 = vsel %vm523_vm1, 1, %v769_v2  ;;  %v497_v27 = vrot.slane %v489_v4, %v865_v18  ;;  %v501_v28 = vrot.slane %v493_v14, %v865_v18 }
  0x9f   : > { %v528_v21 = vrot.slane %v524_v16, %v865_v18  ;;  %v532_v23 = vrot.slane %v524_v16, %v868_v19  ;;  %v567_v38 = vrot.slane %v563_v29, %v865_v18  ;;  %v571_v39 = vrot.slane %v563_v29, %v868_v19 }
  0xa0   : > { %v367_v53 = vpop.permute.xlu0 %366  ;;  %v469_v58 = vpop.permute.xlu1 %468  ;;  %vm503_vm8 = vcmp.eq.s32.totalorder %v501_v28, 1  ;;  %v616_v4 = vsub.s32 1, %v849_v15 }
  0xa1   : > { %v369_v56 = vsel %vm368_vm6, %v365_v41, %v367_v53  ;;  %v370_v57 = vsel %vm368_vm6, %v367_v53, %v365_v41  ;;  %vm502_vm6 = vcmp.eq.s32.totalorder %v497_v27, 1  ;;  %v536_v34 = vrot.slane %v528_v21, %v865_v18 }
  0xa2   : > { %v393_v59 = vsel %vm391_vm14, %v370_v57, 0.0  ;;  %v394_v50 = vsel %vm392_vm11, %v369_v56, 0.0  ;;  %v540_v35 = vrot.slane %v532_v23, %v865_v18  ;;  %v575_v45 = vrot.slane %v567_v38, %v865_v18 }
  0xa3   : > { %v400_v63 = vmul.f32 %v398_v10, %v393_v59  ;;  %v401_v1 = vmul.f32 %v398_v10, %v394_v50  ;;  %vm541_vm14 = vcmp.eq.s32.totalorder %v536_v34, 1  ;;  %v579_v52 = vrot.slane %v571_v39, %v865_v18 }
  0xa4   : > { %v509_v3 = vpop.permute.xlu0 %508  ;;  %v437_v9 = vpop.permute.xlu1 %436  ;;  %vm542_vm11 = vcmp.eq.s32.totalorder %v540_v35, 1  ;;  %vm580_vm5 = vcmp.eq.s32.totalorder %v575_v45, 1 }
  0xa5   : > { %v402_v7 = vadd.f32 %v400_v63, %v362_v61  ;;  %v403_v8 = vadd.f32 %v401_v1, %v363_v62  ;;  %vm581_vm15 = vcmp.eq.s32.totalorder %v579_v52, 1 }
  0xa7   : > { %v434_v10 = vadd.f32 %v432_v5, %v402_v7  ;;  %v435_v11 = vadd.f32 %v433_v6, %v403_v8  ;;  %v650_v6 = vsub.s32 3, %v849_v15 }
  0xa8   : > { %v439_v13 = vpop.permute.xlu0 %438  ;;  %v548_v12 = vpop.permute.xlu1 %547 }
  0xa9   : > { %v441_v17 = vsel %vm440_vm9, %v437_v9, %v439_v13  ;;  %v442_v20 = vsel %vm440_vm9, %v439_v13, %v437_v9 }
  0xaa   : > { %v464_v46 = vsel %vm462_vm13, %v441_v17, 0.0  ;;  %v465_v22 = vsel %vm463_vm12, %v442_v20, 0.0 }
  0xab   : > { %v471_v24 = vmul.f32 %v469_v58, %v464_v46  ;;  %v472_v25 = vmul.f32 %v469_v58, %v465_v22 }
  0xac   : > { %v476_v26 = vpop.permute.xlu0 %475  ;;  %v478_v32 = vpop.permute.xlu1 %477 }
  0xad   : > { %v473_v30 = vadd.f32 %v471_v24, %v434_v10  ;;  %v474_v31 = vadd.f32 %v472_v25, %v435_v11  ;;  %v480_v48 = vsel %vm479_vm0, %v476_v26, %v478_v32  ;;  %v481_v33 = vsel %vm479_vm0, %v478_v32, %v476_v26 }
  0xae   : > { %v504_v36 = vsel %vm502_vm6, %v480_v48, 0.0  ;;  %v505_v37 = vsel %vm503_vm8, %v481_v33, 0.0 }
  0xaf   : > { %v511_v40 = vmul.f32 %v509_v3, %v504_v36  ;;  %v512_v41 = vmul.f32 %v509_v3, %v505_v37 }
  0xb0   : > { %v587_v42 = vpop.permute.xlu0 %586  ;;  %v516_v43 = vpop.permute.xlu1 %515 }
  0xb1   : > { %v513_v2 = vadd.f32 %v511_v40, %v473_v30  ;;  %v514_v44 = vadd.f32 %v512_v41, %v474_v31 }
  0xb4   : > { %v518_v51 = vpop.permute.xlu0 %517  ;;  %v555_v56 = vpop.permute.xlu1 %554 }
  0xb5   : > { %v520_v53 = vsel %vm519_vm7, %v516_v43, %v518_v51  ;;  %v521_v54 = vsel %vm519_vm7, %v518_v51, %v516_v43 }
  0xb6   : > { %v543_v55 = vsel %vm541_vm14, %v520_v53, 0.0  ;;  %v544_v47 = vsel %vm542_vm11, %v521_v54, 0.0 }
  0xb7   : > { %v550_v57 = vmul.f32 %v548_v12, %v543_v55  ;;  %v551_v58 = vmul.f32 %v548_v12, %v544_v47 }
  0xb8   : > { %v557_v59 = vpop.permute.xlu0 %556  ;;  %v608_v14 = vpop.permute.xlu1 %607 }
  0xb9   : > { %v552_v50 = vadd.f32 %v550_v57, %v513_v2  ;;  %v553_v60 = vadd.f32 %v551_v58, %v514_v44  ;;  %v559_v49 = vsel %vm558_vm3, %v555_v56, %v557_v59  ;;  %v560_v61 = vsel %vm558_vm3, %v557_v59, %v555_v56 }
  0xba   : > { %v582_v62 = vsel %vm580_vm5, %v559_v49, 0.0  ;;  %v583_v63 = vsel %vm581_vm15, %v560_v61, 0.0 }
  0xbb   : > { %v589_v1 = vmul.f32 %v587_v42, %v582_v62  ;;  %v590_v3 = vmul.f32 %v587_v42, %v583_v63 }
  0xbc   : > { %v625_v5 = vpop.permute.xlu0 %624  ;;  %v642_v15 = vpop.permute.xlu1 %641 }
  0xbd   : > { %v591_v0 = vadd.f32 %v589_v1, %v552_v50  ;;  %v592_v7 = vadd.f32 %v590_v3, %v553_v60 }
  0xbf   : > { %v600_v8 = vrot.slane %v591_v0, %v865_v18  ;;  %v604_v9 = vrot.slane %v592_v7, %v865_v18  ;;  %v617_v10 = vrot.slane %v591_v0, %v616_v4  ;;  %v621_v11 = vrot.slane %v592_v7, %v616_v4 }
  0xc0   : > { %v634_v16 = vrot.slane %v591_v0, %v868_v19  ;;  %v638_v13 = vrot.slane %v592_v7, %v868_v19  ;;  %v651_v27 = vrot.slane %v591_v0, %v650_v6  ;;  %v655_v28 = vrot.slane %v592_v7, %v650_v6  ;;  %v659_v22 = vpop.permute.xlu0 %658 }
  0xc1   : > { %v610_v17 = vmul.f32 %v608_v14, %v600_v8  ;;  %v611_v20 = vmul.f32 %v608_v14, %v604_v9  ;;  %v627_v12 = vmul.f32 %v625_v5, %v617_v10  ;;  %v628_v46 = vmul.f32 %v625_v5, %v621_v11 }
  0xc2   : > { %v644_v24 = vmul.f32 %v642_v15, %v634_v16  ;;  %v645_v25 = vmul.f32 %v642_v15, %v638_v13  ;;  %v661_v29 = vmul.f32 %v659_v22, %v651_v27  ;;  %v662_v30 = vmul.f32 %v659_v22, %v655_v28 }
  0xc3   : > { %v629_v21 = vadd.f32 %v627_v12, %v610_v17  ;;  %v630_v23 = vadd.f32 %v628_v46, %v611_v20 }
  0xc5   : > { %v646_v18 = vadd.f32 %v644_v24, %v629_v21  ;;  %v647_v26 = vadd.f32 %v645_v25, %v630_v23 }
  0xc7   : > { %v663_v19 = vadd.f32 %v661_v29, %v646_v18  ;;  %v664_v31 = vadd.f32 %v662_v30, %v647_v26 }
  0xc9   : > { %665 = vst [vmem:[%s197_s10] sm:$0xff] %v663_v19  ;;  %666 = vst [vmem:[%s197_s10 + $0x8] sm:$0xff] %v664_v31 }
  0xca PF: > { %s14_s15 = sadd.s32 1, %s767_s15  }
  0xcb   : > { %p11_p4 = scmp.ge.s32.totalorder %s14_s15, 4  }
  0xcd   :  { %13 = sbr.rel (!%p11_p4) target bundleno = 1 (0x1), region = 66 }

</bundles_post_ra>
